<compile_context>
chip_gen: v5e
topology: v5e:2x2
jax: 0.10.0
libtpu: 0.0.40
codegen_flags: <defaults>
</compile_context>

<pallas_src>
import jax
import jax.numpy as jnp
from jax.experimental import pallas as pl
from jax.experimental.pallas import tpu as pltpu


def _triplet_mlp_kernel(x1_ref, x2_ref, x3_ref,
                        w1_ref, b1_ref, w2_ref, b2_ref,
                        o_ref):
    """Fused TripletNet forward for one row tile.

    x*_ref : (tm, D)      f32 flattened inputs (cast to bf16 for the MXU)
    w1_ref : (D, H)       bf16 shared first-layer weight   (grid-invariant)
    b1_ref : (1, H)       f32 first-layer bias
    w2_ref : (H, E)       bf16 shared second-layer weight  (grid-invariant)
    b2_ref : (1, E)       f32 second-layer bias
    o_ref  : (tm, Epack)  f32 packed embeddings: cols [0:E)=emb(x1),
                          [E:2E)=emb(x2), [2E:3E)=emb(x3), rest zero pad.
    """
    tm = x1_ref.shape[0]
    e = w2_ref.shape[1]
    e_pack = o_ref.shape[1]

    # Shared weights/biases: loaded once, reused for the fused 3*tm batch.
    w1 = w1_ref[...]
    b1 = b1_ref[...]
    w2 = w2_ref[...]
    b2 = b2_ref[...]

    # Fuse the three triplet branches into ONE activation matrix (VMEM-only
    # concat) -> a single matmul pair instead of three.
    x = jnp.concatenate(
        [x1_ref[...], x2_ref[...], x3_ref[...]], axis=0
    ).astype(jnp.bfloat16)                                        # (3tm, D) bf16

    h = jnp.dot(x, w1, preferred_element_type=jnp.float32)        # (3tm, H) f32
    h = jnp.maximum(h + b1, 0.0)                                  # bias + ReLU
    out = jnp.dot(h.astype(jnp.bfloat16), w2,
                  preferred_element_type=jnp.float32) + b2        # (3tm, E) f32

    # Pack the three E-wide embeddings into one lane-dense tile.
    pieces = [out[0 * tm:1 * tm], out[1 * tm:2 * tm], out[2 * tm:3 * tm]]
    pad = e_pack - 3 * e
    if pad > 0:
        pieces.append(jnp.zeros((tm, pad), jnp.float32))
    o_ref[...] = jnp.concatenate(pieces, axis=-1).astype(o_ref.dtype)


def triplet_net_forward(x1, x2, x3, params, *, row_tile=256):
    """TripletNet.forward: returns (emb(x1), emb(x2), emb(x3)).

    x1/x2/x3: (N, C, H, W) float32 arrays (NCHW, PyTorch convention).
    params  : dict with w1 (D,H), b1 (1,H), w2 (H,E), b2 (1,E), all f32.
    """
    w1, b1, w2, b2 = params["w1"], params["b1"], params["w2"], params["b2"]
    n = x1.shape[0]
    d = 1
    for s in x1.shape[1:]:
        d *= int(s)
    hdim = w1.shape[1]
    e = w2.shape[1]
    e_pack = ((3 * e + 127) // 128) * 128       # packed, lane-dense output width

    # Row tiling: degenerates to a single step at tiny N; 'parallel' at scale.
    tm = n if n <= row_tile else row_tile
    grid = (pl.cdiv(n, tm),)

    # Flatten NCHW -> (N, D): a free reshape, no stack / no extra HBM copy.
    x1f = x1.reshape(n, d)
    x2f = x2.reshape(n, d)
    x3f = x3.reshape(n, d)

    # MXU-native bf16 weights; biases stay f32 (added after f32 accumulation).
    w1_bf16 = w1.astype(jnp.bfloat16)
    w2_bf16 = w2.astype(jnp.bfloat16)
    b1 = b1.astype(jnp.float32)
    b2 = b2.astype(jnp.float32)

    packed = pl.pallas_call(
        _triplet_mlp_kernel,
        out_shape=jax.ShapeDtypeStruct((n, e_pack), jnp.float32),
        grid_spec=pltpu.PrefetchScalarGridSpec(
            num_scalar_prefetch=0,
            grid=grid,
            in_specs=[
                pl.BlockSpec((tm, d), lambda i: (i, 0)),       # x1 row tile
                pl.BlockSpec((tm, d), lambda i: (i, 0)),       # x2 row tile
                pl.BlockSpec((tm, d), lambda i: (i, 0)),       # x3 row tile
                pl.BlockSpec((d, hdim), lambda i: (0, 0)),     # W1 (bf16, resident)
                pl.BlockSpec((1, hdim), lambda i: (0, 0)),     # b1
                pl.BlockSpec((hdim, e), lambda i: (0, 0)),     # W2 (bf16, resident)
                pl.BlockSpec((1, e), lambda i: (0, 0)),        # b2
            ],
            out_specs=pl.BlockSpec((tm, e_pack), lambda i: (i, 0)),
        ),
        compiler_params=pltpu.CompilerParams(
            dimension_semantics=("parallel",),   # megacore-shardable row tiles
            vmem_limit_bytes=32 * 1024 * 1024,
        ),
    )(x1f, x2f, x3f, w1_bf16, b1, w2_bf16, b2)

    # Unpack the three embeddings from the lane-packed output.
    o1 = packed[:, 0 * e:1 * e]
    o2 = packed[:, 1 * e:2 * e]
    o3 = packed[:, 2 * e:3 * e]
    return o1, o2, o3


def init_params(key, d, hidden, embed):
    k1, k2, k3, k4 = jax.random.split(key, 4)
    scale1 = 1.0 / jnp.sqrt(d)
    scale2 = 1.0 / jnp.sqrt(hidden)
    return {
        "w1": jax.random.normal(k1, (d, hidden), jnp.float32) * scale1,
        "b1": jax.random.normal(k2, (1, hidden), jnp.float32) * scale1,
        "w2": jax.random.normal(k3, (hidden, embed), jnp.float32) * scale2,
        "b2": jax.random.normal(k4, (1, embed), jnp.float32) * scale2,
    }


def _reference_forward(x1, x2, x3, params):
    """Pure-JAX f32 reference of the same embedding net (sanity check)."""
    def emb(x):
        xf = x.reshape(x.shape[0], -1)
        h = jnp.maximum(xf @ params["w1"] + params["b1"], 0.0)
        return h @ params["w2"] + params["b2"]
    return emb(x1), emb(x2), emb(x3)


if __name__ == "__main__":
    # Small shapes consistent with an image-embedding forward: NCHW inputs.
    N, C, H, W = 2, 4, 16, 16
    D = C * H * W          # 1024
    HIDDEN = 128
    EMBED = 32

    key = jax.random.PRNGKey(0)
    kx1, kx2, kx3, kp = jax.random.split(key, 4)
    x1 = jax.random.normal(kx1, (N, C, H, W), jnp.float32)
    x2 = jax.random.normal(kx2, (N, C, H, W), jnp.float32)
    x3 = jax.random.normal(kx3, (N, C, H, W), jnp.float32)
    params = init_params(kp, D, HIDDEN, EMBED)

    fwd = jax.jit(triplet_net_forward)
    o1, o2, o3 = fwd(x1, x2, x3, params)
    jax.block_until_ready((o1, o2, o3))

    r1, r2, r3 = _reference_forward(x1, x2, x3, params)
    assert o1.shape == (N, EMBED) and o2.shape == (N, EMBED) and o3.shape == (N, EMBED)
    # bf16 MXU operands (f32 accumulation) -> compare to the f32 reference with
    # a correspondingly relaxed tolerance.
    assert jnp.allclose(o1, r1, atol=5e-2, rtol=5e-2)
    assert jnp.allclose(o2, r2, atol=5e-2, rtol=5e-2)
    assert jnp.allclose(o3, r3, atol=5e-2, rtol=5e-2)

    print("KERNEL_OK")
</pallas_src>

<mosaic_0001>
module attributes {stable_mosaic.version = 11 : i64} {
  func.func @_triplet_mlp_kernel(%arg0: i32, %arg1: memref<2x1024xf32, #tpu.memory_space<vmem>>, %arg2: memref<2x1024xf32, #tpu.memory_space<vmem>>, %arg3: memref<2x1024xf32, #tpu.memory_space<vmem>>, %arg4: memref<1024x128xbf16, #tpu.memory_space<vmem>>, %arg5: memref<1x128xf32, #tpu.memory_space<vmem>>, %arg6: memref<128x32xbf16, #tpu.memory_space<vmem>>, %arg7: memref<1x32xf32, #tpu.memory_space<vmem>>, %arg8: memref<2x128xf32, #tpu.memory_space<vmem>>) attributes {dimension_semantics = [#tpu.dimension_semantics<parallel>], iteration_bounds = array<i64: 1>, scalar_prefetch = 0 : i64, scratch_operands = 0 : i64, tpu.core_type = #tpu.core_type<tc>, window_params = [{transform_indices = @transform_0, window_bounds = array<i64: 2, 1024>}, {transform_indices = @transform_1, window_bounds = array<i64: 2, 1024>}, {transform_indices = @transform_2, window_bounds = array<i64: 2, 1024>}, {pipeline_mode = #tpu.pipeline_mode<synchronous>, transform_indices = @transform_3, window_bounds = array<i64: 1024, 128>}, {pipeline_mode = #tpu.pipeline_mode<synchronous>, transform_indices = @transform_4, window_bounds = array<i64: 1, 128>}, {pipeline_mode = #tpu.pipeline_mode<synchronous>, transform_indices = @transform_5, window_bounds = array<i64: 128, 32>}, {pipeline_mode = #tpu.pipeline_mode<synchronous>, transform_indices = @transform_6, window_bounds = array<i64: 1, 32>}, {transform_indices = @transform_7, window_bounds = array<i64: 2, 128>}]} {
    %c0 = arith.constant 0 : index
    %c0_0 = arith.constant 0 : index
    %0 = vector.load %arg4[%c0, %c0_0] : memref<1024x128xbf16, #tpu.memory_space<vmem>>, vector<1024x128xbf16>
    %c0_1 = arith.constant 0 : index
    %c0_2 = arith.constant 0 : index
    %1 = vector.load %arg5[%c0_1, %c0_2] : memref<1x128xf32, #tpu.memory_space<vmem>>, vector<1x128xf32>
    %c0_3 = arith.constant 0 : index
    %c0_4 = arith.constant 0 : index
    %2 = vector.load %arg6[%c0_3, %c0_4] : memref<128x32xbf16, #tpu.memory_space<vmem>>, vector<128x32xbf16>
    %c0_5 = arith.constant 0 : index
    %c0_6 = arith.constant 0 : index
    %3 = vector.load %arg7[%c0_5, %c0_6] : memref<1x32xf32, #tpu.memory_space<vmem>>, vector<1x32xf32>
    %c0_7 = arith.constant 0 : index
    %c0_8 = arith.constant 0 : index
    %4 = vector.load %arg1[%c0_7, %c0_8] : memref<2x1024xf32, #tpu.memory_space<vmem>>, vector<2x1024xf32>
    %c0_9 = arith.constant 0 : index
    %c0_10 = arith.constant 0 : index
    %5 = vector.load %arg2[%c0_9, %c0_10] : memref<2x1024xf32, #tpu.memory_space<vmem>>, vector<2x1024xf32>
    %c0_11 = arith.constant 0 : index
    %c0_12 = arith.constant 0 : index
    %6 = vector.load %arg3[%c0_11, %c0_12] : memref<2x1024xf32, #tpu.memory_space<vmem>>, vector<2x1024xf32>
    %7 = tpu.concatenate %4, %5, %6 in 0 : vector<2x1024xf32>, vector<2x1024xf32>, vector<2x1024xf32> -> vector<6x1024xf32>
    %8 = arith.truncf %7 : vector<6x1024xf32> to vector<6x1024xbf16>
    %cst = arith.constant dense<0.000000e+00> : vector<6x128xf32>
    %9 = tpu.matmul %8, %0, %cst {dimension_numbers = #tpu.dot_dimension_numbers<[1], [0], [0], [1], [0, 0, 1, 1], [], []>} : vector<6x1024xbf16>, vector<1024x128xbf16>, vector<6x128xf32> -> vector<6x128xf32>
    %10 = vector.broadcast %1 : vector<1x128xf32> to vector<6x128xf32>
    %11 = arith.addf %9, %10 : vector<6x128xf32>
    %cst_13 = arith.constant 0.000000e+00 : f32
    %12 = vector.broadcast %cst_13 : f32 to vector<6x128xf32>
    %13 = arith.maximumf %11, %12 : vector<6x128xf32>
    %14 = arith.truncf %13 : vector<6x128xf32> to vector<6x128xbf16>
    %cst_14 = arith.constant dense<0.000000e+00> : vector<6x32xf32>
    %15 = tpu.matmul %14, %2, %cst_14 {dimension_numbers = #tpu.dot_dimension_numbers<[1], [0], [0], [1], [0, 0, 1, 1], [], []>} : vector<6x128xbf16>, vector<128x32xbf16>, vector<6x32xf32> -> vector<6x32xf32>
    %16 = vector.broadcast %3 : vector<1x32xf32> to vector<6x32xf32>
    %17 = arith.addf %15, %16 : vector<6x32xf32>
    %18 = vector.extract_strided_slice %17 {offsets = [0, 0], sizes = [2, 32], strides = [1, 1]} : vector<6x32xf32> to vector<2x32xf32>
    %19 = vector.extract_strided_slice %17 {offsets = [2, 0], sizes = [2, 32], strides = [1, 1]} : vector<6x32xf32> to vector<2x32xf32>
    %20 = vector.extract_strided_slice %17 {offsets = [4, 0], sizes = [2, 32], strides = [1, 1]} : vector<6x32xf32> to vector<2x32xf32>
    %cst_15 = arith.constant 0.000000e+00 : f32
    %21 = vector.broadcast %cst_15 : f32 to vector<2x32xf32>
    %22 = tpu.concatenate %18, %19, %20, %21 in 1 : vector<2x32xf32>, vector<2x32xf32>, vector<2x32xf32>, vector<2x32xf32> -> vector<2x128xf32>
    %c0_16 = arith.constant 0 : index
    %c0_17 = arith.constant 0 : index
    %23 = vector.load %arg8[%c0_16, %c0_17] : memref<2x128xf32, #tpu.memory_space<vmem>>, vector<2x128xf32>
    tpu.vector_store %arg8[%c0_16, %c0_17], %22 {strides = array<i32>} : memref<2x128xf32, #tpu.memory_space<vmem>>, vector<2x128xf32>,
    return
  }
  func.func @transform_0(%arg0: i32) -> (i32, i32) {
    %c0_i32 = arith.constant 0 : i32
    %c0_i32_0 = arith.constant 0 : i32
    return %arg0, %c0_i32 : i32, i32
  }
  func.func @transform_1(%arg0: i32) -> (i32, i32) {
    %c0_i32 = arith.constant 0 : i32
    %c0_i32_0 = arith.constant 0 : i32
    return %arg0, %c0_i32 : i32, i32
  }
  func.func @transform_2(%arg0: i32) -> (i32, i32) {
    %c0_i32 = arith.constant 0 : i32
    %c0_i32_0 = arith.constant 0 : i32
    return %arg0, %c0_i32 : i32, i32
  }
  func.func @transform_3(%arg0: i32) -> (i32, i32) {
    %c0_i32 = arith.constant 0 : i32
    %c0_i32_0 = arith.constant 0 : i32
    %c0_i32_1 = arith.constant 0 : i32
    return %c0_i32, %c0_i32_0 : i32, i32
  }
  func.func @transform_4(%arg0: i32) -> (i32, i32) {
    %c0_i32 = arith.constant 0 : i32
    %c0_i32_0 = arith.constant 0 : i32
    %c0_i32_1 = arith.constant 0 : i32
    return %c0_i32, %c0_i32_0 : i32, i32
  }
  func.func @transform_5(%arg0: i32) -> (i32, i32) {
    %c0_i32 = arith.constant 0 : i32
    %c0_i32_0 = arith.constant 0 : i32
    %c0_i32_1 = arith.constant 0 : i32
    return %c0_i32, %c0_i32_0 : i32, i32
  }
  func.func @transform_6(%arg0: i32) -> (i32, i32) {
    %c0_i32 = arith.constant 0 : i32
    %c0_i32_0 = arith.constant 0 : i32
    %c0_i32_1 = arith.constant 0 : i32
    return %c0_i32, %c0_i32_0 : i32, i32
  }
  func.func @transform_7(%arg0: i32) -> (i32, i32) {
    %c0_i32 = arith.constant 0 : i32
    %c0_i32_0 = arith.constant 0 : i32
    return %arg0, %c0_i32 : i32, i32
  }
}

</mosaic_0001>

<bundles_post_ra>
// kernel: triplet_net_forward.1
= control target key start
LH: loop header
LB: loop body
LE: loop exit
PB: predicated region body
PF: predicated region fallthrough
CT: control target
= control target key end

     0   :  { %vm243_vm0 = vcmask 1041408   ;;  %vm252_vm1 = vcmask 1043456   ;;  %s1210_s8 = smov 32   ;;  %s1211_s9 = smov 64   ;;  %vm835_vm2 = vcmask 261120   ;;  %vm837_vm3 = vcmask 523264   ;;  %s1538_s3 = inlined_call_operand.vmem [shape: bf16[1024,128], index: 3, kind: input, shape index: {}]   ;;  %s1539_s0 = inlined_call_operand.vmem [shape: f32[2,1024], index: 0, kind: input, shape index: {}]   ;;  %s1540_s1 = inlined_call_operand.vmem [shape: f32[2,1024], index: 1, kind: input, shape index: {}]   ;;  %s1541_s4 = inlined_call_operand.vmem [shape: f32[1,128], index: 4, kind: input, shape index: {}]   ;;  %s1542_s2 = inlined_call_operand.vmem [shape: f32[2,1024], index: 2, kind: input, shape index: {}]   ;;  %s1543_s6 = inlined_call_operand.vmem [shape: f32[1,32], index: 6, kind: input, shape index: {}]   ;;  %s1544_s5 = inlined_call_operand.vmem [shape: bf16[128,32], index: 5, kind: input, shape index: {}]   ;;  %s1545_s7 = inlined_call_operand.vmem [shape: f32[2,128], index: 7, kind: output, shape index: {}]  }
   0x1   :  { %v1141_v0 = vld [vmem:[%s1538_s3 + $0x38] sm:$0xff]  ;;  %v1140_v4 = vld [vmem:[%s1538_s3 + $0x30] sm:$0xff]  ;;  %v1139_v8 = vld [vmem:[%s1538_s3 + $0x28] sm:$0xff]  ;;  %vm839_vm4 = vcmask 785408  }
   0x2   :  { %v1149_v1 = vld [vmem:[%s1538_s3 + $0x78] sm:$0xff]  ;;  %656 = vmatpush.bf16.msra.mxu0 %v1141_v0  ;;  %v1148_v5 = vld [vmem:[%s1538_s3 + $0x70] sm:$0xff]  ;;  %v1147_v9 = vld [vmem:[%s1538_s3 + $0x68] sm:$0xff] }
   0x3   :  { %v1157_v2 = vld [vmem:[%s1538_s3 + $0xb8] sm:$0xff]  ;;  %669 = vmatpush.bf16.msra.mxu1 %v1149_v1  ;;  %v1156_v6 = vld [vmem:[%s1538_s3 + $0xb0] sm:$0xff]  ;;  %v1155_v10 = vld [vmem:[%s1538_s3 + $0xa8] sm:$0xff] }
   0x4   :  { %v1165_v3 = vld [vmem:[%s1538_s3 + $0xf8] sm:$0xff]  ;;  %682 = vmatpush.bf16.msra.mxu2 %v1157_v2  ;;  %v1164_v7 = vld [vmem:[%s1538_s3 + $0xf0] sm:$0xff]  ;;  %v1163_v11 = vld [vmem:[%s1538_s3 + $0xe8] sm:$0xff] }
   0x5   :  { %695 = vmatpush.bf16.msra.mxu3 %v1165_v3  ;;  %v1138_v12 = vld [vmem:[%s1538_s3 + $0x20] sm:$0xff]  ;;  %v173_v17 = vld [vmem:[%s1539_s0 + $0x8] sm:$0xff]  ;;  %v1137_v18 = vld [vmem:[%s1538_s3 + $0x18] sm:$0xff] }
   0x6   :  { %657 = vmatpush.bf16.msra.mxu0 %v1140_v4  ;;  %v1146_v13 = vld [vmem:[%s1538_s3 + $0x60] sm:$0xff]  ;;  %v1145_v19 = vld [vmem:[%s1538_s3 + $0x58] sm:$0xff]  ;;  %182 = vst [vmem:[#allocation1 + $0x20] ss:$4 sm:$0xff] %v173_v17  ;;  %v1136_v22 = vld [vmem:[%s1538_s3 + $0x10] sm:$0xff] }
   0x7   :  { %670 = vmatpush.bf16.msra.mxu1 %v1148_v5  ;;  %v1154_v14 = vld [vmem:[%s1538_s3 + $0xa0] sm:$0xff]  ;;  %v1153_v20 = vld [vmem:[%s1538_s3 + $0x98] sm:$0xff]  ;;  %v1144_v23 = vld [vmem:[%s1538_s3 + $0x50] sm:$0xff] }
   0x8   :  { %683 = vmatpush.bf16.msra.mxu2 %v1156_v6  ;;  %v1162_v15 = vld [vmem:[%s1538_s3 + $0xe0] sm:$0xff]  ;;  %v1161_v21 = vld [vmem:[%s1538_s3 + $0xd8] sm:$0xff]  ;;  %v1152_v24 = vld [vmem:[%s1538_s3 + $0x90] sm:$0xff] }
   0x9   :  { %696 = vmatpush.bf16.msra.mxu3 %v1164_v7  ;;  %v172_v16 = vld [vmem:[%s1539_s0] sm:$0xff]  ;;  %v1160_v25 = vld [vmem:[%s1538_s3 + $0xd0] sm:$0xff]  ;;  %v1135_v26 = vld [vmem:[%s1538_s3 + $0x8] sm:$0xff] }
   0xa   :  { %658 = vmatpush.bf16.msra.mxu0 %v1139_v8  ;;  %180 = vst [vmem:[#allocation1] ss:$4 sm:$0xff] %v172_v16  ;;  %v1143_v27 = vld [vmem:[%s1538_s3 + $0x48] sm:$0xff]  ;;  %v174_v28 = vld [vmem:[%s1540_s1] sm:$0xff]  ;;  %v1173_v44 = vld [vmem:[%s1538_s3 + $0x138] sm:$0xff] }
   0xb   :  { %671 = vmatpush.bf16.msra.mxu1 %v1147_v9  ;;  %v1151_v33 = vld [vmem:[%s1538_s3 + $0x88] sm:$0xff]  ;;  %v1134_v39 = vld [vmem:[%s1538_s3] sm:$0xff]  ;;  %v1181_v45 = vld [vmem:[%s1538_s3 + $0x178] sm:$0xff] }
   0xc   :  { %684 = vmatpush.bf16.msra.mxu2 %v1155_v10  ;;  %v1159_v34 = vld [vmem:[%s1538_s3 + $0xc8] sm:$0xff]  ;;  %v1142_v40 = vld [vmem:[%s1538_s3 + $0x40] sm:$0xff]  ;;  %v1189_v46 = vld [vmem:[%s1538_s3 + $0x1b8] sm:$0xff] }
   0xd   :  { %697 = vmatpush.bf16.msra.mxu3 %v1163_v11  ;;  %v175_v35 = vld [vmem:[%s1540_s1 + $0x8] sm:$0xff]  ;;  %v1352_v36 = vld.sshfl [vmem:[#allocation1 + $0x20] sm:$0xff pattern:$0x73625140]  ;;  %v1197_v47 = vld [vmem:[%s1538_s3 + $0x1f8] sm:$0xff] }
   0xe   :  { %659 = vmatpush.bf16.msra.mxu0 %v1138_v12  ;;  %v1354_v37 = vld.sshfl [vmem:[#allocation1 + $0x28] sm:$0xff pattern:$0x73625140]  ;;  %v1356_v38 = vld.sshfl [vmem:[#allocation1 + $0x30] sm:$0xff pattern:$0x73625140] }
   0xf   :  { %672 = vmatpush.bf16.msra.mxu1 %v1146_v13  ;;  %v1150_v41 = vld [vmem:[%s1538_s3 + $0x80] sm:$0xff]  ;;  %v1370_v43 = vld.sshfl [vmem:[#allocation1 + $0x38] sm:$0xff pattern:$0x73625140]  ;;  %v1172_v53 = vld [vmem:[%s1538_s3 + $0x130] sm:$0xff] }
  0x10   :  { %685 = vmatpush.bf16.msra.mxu2 %v1154_v14  ;;  %v1158_v42 = vld [vmem:[%s1538_s3 + $0xc0] sm:$0xff]  ;;  %204 = vst [vmem:[#allocation1 + $0x21] ss:$4 sm:$0xff] %v175_v35  ;;  %v1180_v54 = vld [vmem:[%s1538_s3 + $0x170] sm:$0xff]  ;;  %v177_v57 = vld [vmem:[%s1542_s2 + $0x8] sm:$0xff] }
  0x11   :  { %698 = vmatpush.bf16.msra.mxu3 %v1162_v15  ;;  %v1339_v29 = vld.sshfl [vmem:[#allocation1] sm:$0xff pattern:$0x73625140]  ;;  %v1341_v30 = vld.sshfl [vmem:[#allocation1 + $0x8] sm:$0xff pattern:$0x73625140] }
  0x12   :  { %660 = vmatpush.bf16.msra.mxu0 %v1137_v18  ;;  %v185_v31 = vld.sshfl [vmem:[#allocation1 + $0x10] sm:$0xff pattern:$0x73625140]  ;;  %v186_v32 = vld.sshfl [vmem:[#allocation1 + $0x18] sm:$0xff pattern:$0x73625140] }
  0x13   :  { %673 = vmatpush.bf16.msra.mxu1 %v1145_v19  ;;  %202 = vst [vmem:[#allocation1 + $0x1] ss:$4 sm:$0xff] %v174_v28  ;;  %v176_v48 = vld [vmem:[%s1542_s2] sm:$0xff]  ;;  %v1188_v55 = vld [vmem:[%s1538_s3 + $0x1b0] sm:$0xff]  ;;  %v1171_v58 = vld [vmem:[%s1538_s3 + $0x128] sm:$0xff] }
  0x14   :  { %686 = vmatpush.bf16.msra.mxu2 %v1153_v20  ;;  %v1196_v56 = vld [vmem:[%s1538_s3 + $0x1f0] sm:$0xff]  ;;  %v1179_v59 = vld [vmem:[%s1538_s3 + $0x168] sm:$0xff]  ;;  %v1170_v5 = vld [vmem:[%s1538_s3 + $0x120] sm:$0xff] }
  0x15   :  { %699 = vmatpush.bf16.msra.mxu3 %v1161_v21  ;;  %v1187_v1 = vld [vmem:[%s1538_s3 + $0x1a8] sm:$0xff]  ;;  %v1186_v16 = vld [vmem:[%s1538_s3 + $0x1a0] sm:$0xff]  ;;  %v1176_v28 = vld [vmem:[%s1538_s3 + $0x150] sm:$0xff] }
  0x16   :  { %661 = vmatpush.bf16.msra.mxu0 %v1136_v22  ;;  %v1195_v2 = vld [vmem:[%s1538_s3 + $0x1e8] sm:$0xff]  ;;  %v1178_v19 = vld [vmem:[%s1538_s3 + $0x160] sm:$0xff]  ;;  %v1169_v22 = vld [vmem:[%s1538_s3 + $0x118] sm:$0xff] }
  0x17   :  { %674 = vmatpush.bf16.msra.mxu1 %v1144_v23  ;;  %v209_v60 = vld.sshfl [vmem:[#allocation1 + $0x20] sm:$0xff pattern:$0x73625140]  ;;  %v1408_v61 = vld.sshfl [vmem:[#allocation1 + $0x28] sm:$0xff pattern:$0x73625140] }
  0x18   :  { %687 = vmatpush.bf16.msra.mxu2 %v1152_v24  ;;  %v1410_v62 = vld.sshfl [vmem:[#allocation1 + $0x30] sm:$0xff pattern:$0x73625140]  ;;  %v1412_v63 = vld.sshfl [vmem:[#allocation1 + $0x38] sm:$0xff pattern:$0x73625140] }
  0x19   :  { %700 = vmatpush.bf16.msra.mxu3 %v1160_v25  ;;  %226 = vst [vmem:[#allocation1 + $0x22] ss:$4 sm:$0xff] %v177_v57  ;;  %v1194_v20 = vld [vmem:[%s1538_s3 + $0x1e0] sm:$0xff]  ;;  %v1185_v23 = vld [vmem:[%s1538_s3 + $0x198] sm:$0xff]  ;;  %v1191_v35 = vld [vmem:[%s1538_s3 + $0x1c8] sm:$0xff] }
  0x1a   :  { %662 = vmatpush.bf16.msra.mxu0 %v1135_v26  ;;  %v205_v49 = vld.sshfl [vmem:[#allocation1] sm:$0xff pattern:$0x73625140]  ;;  %v206_v50 = vld.sshfl [vmem:[#allocation1 + $0x8] sm:$0xff pattern:$0x73625140] }
  0x1b   :  { %675 = vmatpush.bf16.msra.mxu1 %v1143_v27  ;;  %v207_v51 = vld.sshfl [vmem:[#allocation1 + $0x10] sm:$0xff pattern:$0x73625140]  ;;  %v208_v52 = vld.sshfl [vmem:[#allocation1 + $0x18] sm:$0xff pattern:$0x73625140]  ;;  %v244_v3 = vsel %vm243_vm0, %v1339_v29, %v205_v49  ;;  %v245_v8 = vsel %vm243_vm0, %v1341_v30, %v206_v50 }
  0x1c   :  { %688 = vmatpush.bf16.msra.mxu2 %v1151_v33  ;;  %224 = vst [vmem:[#allocation1 + $0x2] ss:$4 sm:$0xff] %v176_v48  ;;  %v246_v0 = vsel %vm243_vm0, %v185_v31, %v207_v51  ;;  %v247_v4 = vsel %vm243_vm0, %v186_v32, %v208_v52  ;;  %v1177_v24 = vld [vmem:[%s1538_s3 + $0x158] sm:$0xff]  ;;  %v1168_v26 = vld [vmem:[%s1538_s3 + $0x110] sm:$0xff]  ;;  %v1167_v30 = vld [vmem:[%s1538_s3 + $0x108] sm:$0xff]  ;;  %v248_v33 = vsel %vm243_vm0, %v1352_v36, %v209_v60 }
  0x1d   :  { %701 = vmatpush.bf16.msra.mxu3 %v1159_v34  ;;  %v1193_v25 = vld [vmem:[%s1538_s3 + $0x1d8] sm:$0xff]  ;;  %v1184_v27 = vld [vmem:[%s1538_s3 + $0x190] sm:$0xff]  ;;  %v1183_v31 = vld [vmem:[%s1538_s3 + $0x188] sm:$0xff]  ;;  %v249_v36 = vsel %vm243_vm0, %v1354_v37, %v1408_v61 }
  0x1e   :  { %663 = vmatpush.bf16.msra.mxu0 %v1134_v39  ;;  %v1192_v29 = vld [vmem:[%s1538_s3 + $0x1d0] sm:$0xff]  ;;  %v1175_v34 = vld [vmem:[%s1538_s3 + $0x148] sm:$0xff]  ;;  %v1174_v37 = vld [vmem:[%s1538_s3 + $0x140] sm:$0xff] }
  0x1f   :  { %676 = vmatpush.bf16.msra.mxu1 %v1142_v40  ;;  %v250_v40 = vsel %vm243_vm0, %v1356_v38, %v1410_v62  ;;  %v1182_v38 = vld [vmem:[%s1538_s3 + $0x180] sm:$0xff]  ;;  %v1199_v60 = vld [vmem:[%s1544_s5 + $0x8] sm:$0xff] }
  0x20   :  { %689 = vmatpush.bf16.msra.mxu2 %v1150_v41  ;;  %v231_v32 = vld.sshfl [vmem:[#allocation1 + $0x20] sm:$0xff pattern:$0x73625140]  ;;  %v233_v39 = vld.sshfl [vmem:[#allocation1 + $0x30] sm:$0xff pattern:$0x73625140] }
  0x21   :  { %702 = vmatpush.bf16.msra.mxu3 %v1158_v42  ;;  %v232_v41 = vld.sshfl [vmem:[#allocation1 + $0x28] sm:$0xff pattern:$0x73625140]  ;;  %v234_v42 = vld.sshfl [vmem:[#allocation1 + $0x38] sm:$0xff pattern:$0x73625140] }
  0x22   :  { %708 = vmatpush.bf16.msrb.mxu0 %v1173_v44  ;;  %v251_v44 = vsel %vm243_vm0, %v1370_v43, %v1412_v63  ;;  %v1190_v43 = vld [vmem:[%s1538_s3 + $0x1c0] sm:$0xff]  ;;  %v258_v48 = vsel %vm252_vm1, %v249_v36, %v232_v41 }
  0x23   :  { %721 = vmatpush.bf16.msrb.mxu1 %v1181_v45  ;;  %v229_v6 = vld.sshfl [vmem:[#allocation1 + $0x10] sm:$0xff pattern:$0x73625140]  ;;  %v227_v7 = vld.sshfl [vmem:[#allocation1] sm:$0xff pattern:$0x73625140]  ;;  %v260_v49 = vsel %vm252_vm1, %v251_v44, %v234_v42  ;;  %v266_v52 = vpack.c.bf16 %v258_v48, %v258_v48 }
  0x24   :  { %734 = vmatpush.bf16.msrb.mxu2 %v1189_v46  ;;  %v255_v9 = vsel %vm252_vm1, %v246_v0, %v229_v6  ;;  %v253_v10 = vsel %vm252_vm1, %v244_v3, %v227_v7  ;;  %v230_v11 = vld.sshfl [vmem:[#allocation1 + $0x18] sm:$0xff pattern:$0x73625140]  ;;  %v228_v12 = vld.sshfl [vmem:[#allocation1 + $0x8] sm:$0xff pattern:$0x73625140]  ;;  %v257_v46 = vsel %vm252_vm1, %v248_v33, %v231_v32 }
  0x25   :  { %747 = vmatpush.bf16.msrb.mxu3 %v1197_v47  ;;  %v263_v13 = vpack.c.bf16 %v255_v9, %v255_v9  ;;  %v261_v14 = vpack.c.bf16 %v253_v10, %v253_v10  ;;  %v256_v15 = vsel %vm252_vm1, %v247_v4, %v230_v11  ;;  %v254_v18 = vsel %vm252_vm1, %v245_v8, %v228_v12  ;;  %v1166_v45 = vld [vmem:[%s1538_s3 + $0x100] sm:$0xff] }
  0x26   :  { %709 = vmatpush.bf16.msrb.mxu0 %v1172_v53  ;;  %v264_v17 = vpack.c.bf16 %v256_v15, %v256_v15  ;;  %v262_v21 = vpack.c.bf16 %v254_v18, %v254_v18  ;;  %v259_v47 = vsel %vm252_vm1, %v250_v40, %v233_v39  ;;  %v265_v50 = vpack.c.bf16 %v257_v46, %v257_v46  ;;  %v1202_v57 = vld [vmem:[%s1544_s5 + $0x20] sm:$0xff] }
  0x27   :  { %722 = vmatpush.bf16.msrb.mxu1 %v1180_v54  ;;  %690 = vmatmul.bf16.vlgmr.msra.gmra.mxu2 %v263_v13  ;;  %v267_v51 = vpack.c.bf16 %v259_v47, %v259_v47  ;;  %v268_v53 = vpack.c.bf16 %v260_v49, %v260_v49  ;;  %v1205_v54 = vld [vmem:[%s1544_s5 + $0x38] sm:$0xff]  ;;  %v1198_v63 = vld [vmem:[%s1544_s5] sm:$0xff] }
  0x28   :  { %735 = vmatpush.bf16.msrb.mxu2 %v1188_v55  ;;  %664 = vmatmul.bf16.vlgmr.msra.gmra.mxu0 %v261_v14  ;;  %v1204_v55 = vld [vmem:[%s1544_s5 + $0x30] sm:$0xff]  ;;  %v1208_v0 = vld [vmem:[%s1541_s4] ss:$0 sm:$0xff] }
  0x29   :  { %748 = vmatpush.bf16.msrb.mxu3 %v1196_v56  ;;  %677 = vmatmul.bf16.vlgmr.msra.gmra.mxu1 %v262_v21  ;;  %v1203_v56 = vld [vmem:[%s1544_s5 + $0x28] sm:$0xff] }
  0x2a   :  { %710 = vmatpush.bf16.msrb.mxu0 %v1171_v58  ;;  %703 = vmatmul.bf16.vlgmr.msra.gmra.mxu3 %v264_v17  ;;  %v1201_v58 = vld [vmem:[%s1544_s5 + $0x18] sm:$0xff] }
  0x2b   :  { %723 = vmatpush.bf16.msrb.mxu1 %v1179_v59  ;;  %v1200_v59 = vld [vmem:[%s1544_s5 + $0x10] sm:$0xff] }
  0x2c   :  { %736 = vmatpush.bf16.msrb.mxu2 %v1187_v1 }
  0x2d   :  { %749 = vmatpush.bf16.msrb.mxu3 %v1195_v2 }
  0x2e   :  { %711 = vmatpush.bf16.msrb.mxu0 %v1170_v5 }
  0x2f   :  { %724 = vmatpush.bf16.msrb.mxu1 %v1178_v19 }
  0x30   :  { %737 = vmatpush.bf16.msrb.mxu2 %v1186_v16 }
  0x31   :  { %750 = vmatpush.bf16.msrb.mxu3 %v1194_v20 }
  0x32   :  { %712 = vmatpush.bf16.msrb.mxu0 %v1169_v22 }
  0x33   :  { %725 = vmatpush.bf16.msrb.mxu1 %v1177_v24 }
  0x34   :  { %738 = vmatpush.bf16.msrb.mxu2 %v1185_v23 }
  0x35   :  { %751 = vmatpush.bf16.msrb.mxu3 %v1193_v25  ;;  %v1209_v25 = vld [vmem:[%s1543_s6] ss:$0 sm:$0xff] }
  0x36   :  { %713 = vmatpush.bf16.msrb.mxu0 %v1168_v26 }
  0x37   :  { %726 = vmatpush.bf16.msrb.mxu1 %v1176_v28 }
  0x38   :  { %739 = vmatpush.bf16.msrb.mxu2 %v1184_v27 }
  0x39   :  { %752 = vmatpush.bf16.msrb.mxu3 %v1192_v29 }
  0x3a   :  { %714 = vmatpush.bf16.msrb.mxu0 %v1167_v30 }
  0x3b   :  { %727 = vmatpush.bf16.msrb.mxu1 %v1175_v34 }
  0x3c   :  { %740 = vmatpush.bf16.msrb.mxu2 %v1183_v31 }
  0x3d   :  { %753 = vmatpush.bf16.msrb.mxu3 %v1191_v35 }
  0x3e   :  { %715 = vmatpush.bf16.msrb.mxu0 %v1166_v45 }
  0x3f   :  { %728 = vmatpush.bf16.msrb.mxu1 %v1174_v37 }
  0x40   :  { %741 = vmatpush.bf16.msrb.mxu2 %v1182_v38 }
  0x41   :  { %754 = vmatpush.bf16.msrb.mxu3 %v1190_v43  ;;  %716 = vmatmul.bf16.vlgmr.msrb.gmra.mxu0 %v265_v50 }
  0x42   :  { %729 = vmatmul.bf16.vlgmr.msrb.gmra.mxu1 %v266_v52  ;;  %813 = vmatpush.bf16.msra.mxu0 %v1205_v54 }
  0x43   :  { %742 = vmatmul.bf16.vlgmr.msrb.gmra.mxu2 %v267_v51 }
  0x44   :  { %755 = vmatmul.bf16.vlgmr.msrb.gmra.mxu3 %v268_v53 }
  0x46   :  { %814 = vmatpush.bf16.msra.mxu0 %v1204_v55 }
  0x4a   :  { %815 = vmatpush.bf16.msra.mxu0 %v1203_v56 }
  0x4e   :  { %816 = vmatpush.bf16.msra.mxu0 %v1202_v57 }
  0x52   :  { %817 = vmatpush.bf16.msra.mxu0 %v1201_v58 }
  0x56   :  { %818 = vmatpush.bf16.msra.mxu0 %v1200_v59 }
  0x5a   :  { %819 = vmatpush.bf16.msra.mxu0 %v1199_v60 }
  0x5e   :  { %820 = vmatpush.bf16.msra.mxu0 %v1198_v63 }
  0xa5   :  { %v665_v61 = vpop.f32.mrf.mxu0 }
  0xa6   :  { %v678_v62 = vpop.f32.mrf.mxu1  ;;  %v666_v3 = vadd.f32 %v1208_v0, %v665_v61 }
  0xa8   :  { %v679_v6 = vadd.f32 %v678_v62, %v666_v3 }
  0xaa   :  { %v691_v1 = vpop.f32.mrf.mxu2 }
  0xab   :  { %v692_v9 = vadd.f32 %v691_v1, %v679_v6 }
  0xad   :  { %v704_v2 = vpop.f32.mrf.mxu3  ;;  %v667_v4 = vpop.f32.mrf.mxu0 }
  0xae   :  { %v680_v5 = vpop.f32.mrf.mxu1  ;;  %v705_v10 = vadd.f32 %v704_v2, %v692_v9 }
  0xb2   :  { %v693_v7 = vpop.f32.mrf.mxu2 }
  0xb5   :  { %v706_v8 = vpop.f32.mrf.mxu3 }
  0xbe   :  { %v717_v11 = vpop.f32.mrf.mxu0 }
  0xbf   :  { %v718_v12 = vadd.f32 %v717_v11, %v705_v10  ;;  %v730_v13 = vpop.f32.mrf.mxu1 }
  0xc1   :  { %v731_v14 = vadd.f32 %v730_v13, %v718_v12 }
  0xc6   :  { %v743_v15 = vpop.f32.mrf.mxu2  ;;  %v719_v18 = vpop.f32.mrf.mxu0 }
  0xc7   :  { %v744_v16 = vadd.f32 %v743_v15, %v731_v14  ;;  %v756_v17 = vpop.f32.mrf.mxu3  ;;  %v732_v20 = vpop.f32.mrf.mxu1 }
  0xc9   :  { %v757_v19 = vadd.f32 %v756_v17, %v744_v16 }
  0xcb   :  { %v760_v21 = vmax.f32 %v757_v19, 0.0 }
  0xcd   :  { %v761_v22 = vpack.c.bf16 %v760_v21, %v760_v21 }
  0xce   :  { %v745_v23 = vpop.f32.mrf.mxu2 }
  0xcf   :  { %v758_v24 = vpop.f32.mrf.mxu3  ;;  %821 = vmatmul.bf16.vlgmr.msra.gmra.mxu0 %v761_v22 }
 0x14c   :  { %v822_v26 = vpop.f32.mrf.mxu0 }
 0x14d   :  { %v823_v27 = vadd.f32 %v1209_v25, %v822_v26 }
 0x14f   :  { %v827_v28 = vrot.slane %v823_v27, 2  ;;  %v831_v30 = vrot.slane %v823_v27, 4 }
 0x151   :  { %828 = vrot.lane.b32.xlu0 %v827_v28, %s1210_s8 }
 0x154   :  { %v824_v29 = vpop.f32.mrf.mxu0 }
 0x159   :  { %832 = vrot.lane.b32.xlu0 %v831_v30, %s1211_s9 }
 0x1c3   :  { %v829_v31 = vpop.permute.xlu0 %828 }
 0x1c4   :  { %v836_v32 = vsel %vm835_vm2, %v823_v27, %v829_v31 }
 0x1cb   :  { %v833_v33 = vpop.permute.xlu0 %832 }
 0x1cc   :  { %v838_v34 = vsel %vm837_vm3, %v836_v32, %v833_v33 }
 0x1cd   :  { %v840_v35 = vsel %vm839_vm4, %v838_v34, 0.0 }
 0x1ce   :  { %841 = vst [vmem:[%s1545_s7] sm:$0x3] %v840_v35 }

</bundles_post_ra>
